<compile_context>
chip_gen: v6e
topology: v6e:2x2x1
jax: 0.10.0
libtpu: 0.0.40
codegen_flags: <defaults>
</compile_context>

<pallas_src>
import math
import functools

import jax
import jax.numpy as jnp
from jax import lax
from jax.experimental import pallas as pl
from jax.experimental.pallas import tpu as pltpu


def _round_up(x, m):
    return ((x + m - 1) // m) * m


def _cdiv(a, b):
    return (a + b - 1) // b


def _vmem_limit(estimate_bytes):
    # Explicit scoped-VMEM limit: generous headroom, clamped so it is valid on
    # every generation (v7x has 64 MiB physical VMEM per TensorCore).
    return int(min(max(2 * estimate_bytes, 32 * 2**20), 64 * 2**20))


def _pick_tiles(seq_len, align, block_q, block_k):
    """Divisor-aware (TQ, TK, S_pad) with TQ a multiple of TK."""
    block_q = max(align, _round_up(block_q, align))
    block_k = max(align, _round_up(block_k, align))
    nq = _cdiv(seq_len, block_q)
    tq = _round_up(_cdiv(seq_len, nq), align)
    nk_per_q = max(1, _cdiv(tq, block_k))
    tk = _round_up(_cdiv(tq, nk_per_q), align)
    tq = tk * _cdiv(tq, tk)                       # TQ is a multiple of TK
    s_pad = _round_up(seq_len, tq)
    return tq, tk, s_pad


# ----------------------------------------------------------------------------
# Kernel 1: fused QKV projection  y = x @ [Wq*scale | Wk | Wv] + [bq*scale|bk|bv]
# Grid = (B, seq-tiles, column-tiles of the fused weight).
# ----------------------------------------------------------------------------
def _qkv_proj_kernel(x_ref, w_ref, b_ref, y_ref):
    x = x_ref[0]                                                    # (T, D_in)
    y = jnp.dot(x, w_ref[...], preferred_element_type=jnp.float32)  # MXU, f32 acc
    y = y + b_ref[...]                                              # f32 bias add
    y_ref[0] = y.astype(y_ref.dtype)


# ----------------------------------------------------------------------------
# Kernel 2: flash attention (online softmax over KV tiles, reduction axis last)
# ----------------------------------------------------------------------------
def _flash_attn_kernel(q_ref, k_ref, v_ref, o_ref, m_sc, l_sc, acc_sc, *,
                       seq_len, seq_pad, block_k, approx_recip):
    ki = pl.program_id(2)

    @pl.when(ki == 0)
    def _():
        m_sc[...] = jnp.full(m_sc.shape, -jnp.inf, dtype=m_sc.dtype)
        l_sc[...] = jnp.zeros(l_sc.shape, dtype=l_sc.dtype)
        acc_sc[...] = jnp.zeros(acc_sc.shape, dtype=acc_sc.dtype)

    q = q_ref[0]                                                    # (TQ, Hp)
    k = k_ref[0]                                                    # (TK, Hp)
    v = v_ref[0]                                                    # (TK, Hp)

    # S = Q @ K^T, contracting last dims — no XLU transpose; f32 accumulation.
    s = lax.dot_general(q, k, (((1,), (1,)), ((), ())),
                        preferred_element_type=jnp.float32)         # (TQ, TK)

    # KV padding mask: only emitted if the sequence was padded; built as a
    # cheap (1, TK) row mask broadcast in the where.  Padding is always at the
    # end of the sequence, so the first KV tile always has real columns and
    # the online-softmax max can never be -inf on its first update.
    if seq_pad != seq_len:
        kv_idx = ki * block_k + lax.broadcasted_iota(jnp.int32, (1, block_k), 1)
        s = jnp.where(kv_idx < seq_len, s, -jnp.inf)

    m_prev = m_sc[...]
    m_new = jnp.maximum(m_prev, jnp.max(s, axis=-1, keepdims=True))
    alpha = jnp.exp(m_prev - m_new)
    p = jnp.exp(s - m_new)                                          # f32 elementwise
    l_sc[...] = alpha * l_sc[...] + jnp.sum(p, axis=-1, keepdims=True)
    acc_sc[...] = alpha * acc_sc[...] + jnp.dot(
        p.astype(v.dtype), v, preferred_element_type=jnp.float32)
    m_sc[...] = m_new

    @pl.when(ki == pl.num_programs(2) - 1)
    def _():
        if approx_recip:
            inv_l = pl.reciprocal(l_sc[...], approx=True)
        else:
            inv_l = 1.0 / l_sc[...]
        o_ref[0] = (acc_sc[...] * inv_l).astype(o_ref.dtype)


# ----------------------------------------------------------------------------
# Wrapper
# ----------------------------------------------------------------------------
def standard_attention(x, w_q, b_q, w_k, b_k, w_v, b_v, *,
                       block_q=512, block_k=256,
                       qkv_dtype=jnp.bfloat16, approx_recip=False):
    """x: (B, S, D_in); w_*: (D_in, H); b_*: (H,). Returns (B, S, H) in x.dtype.

    qkv_dtype: dtype of the matmul operands (Q/K/V intermediates and kernel-1
      operands). Defaults to bf16 for full MXU throughput on all generations;
      all accumulation and softmax elementwise math stays float32.
    approx_recip: opt-in approximate EUP reciprocal for the softmax denominator.
    """
    B, S, D_in = x.shape
    H = w_q.shape[1]
    scale = 1.0 / math.sqrt(H)
    out_dtype = x.dtype
    qkv_bytes = jnp.dtype(qkv_dtype).itemsize
    out_bytes = jnp.dtype(out_dtype).itemsize

    # Lane-dense hidden dim; divisor-aware sequence tiles (TQ multiple of TK,
    # rows aligned for sub-32-bit sublane packing when qkv_dtype is narrow).
    Hp = _round_up(H, 128)
    align = 16 if qkv_bytes < 4 else 8
    TQ, TK, S_pad = _pick_tiles(S, align, block_q, block_k)
    n_q = S_pad // TQ
    n_k = S_pad // TK

    if S_pad != S:
        x = jnp.pad(x, ((0, 0), (0, S_pad - S), (0, 0)))
    x = x.astype(qkv_dtype)

    # Fold 1/sqrt(H) into W_q/b_q, pad H -> Hp, fuse into one (D_in, 3*Hp) weight.
    def _pad_h(w, b):
        return jnp.pad(w, ((0, 0), (0, Hp - H))), jnp.pad(b, (0, Hp - H))

    wq_p, bq_p = _pad_h(w_q * scale, b_q * scale)
    wk_p, bk_p = _pad_h(w_k, b_k)
    wv_p, bv_p = _pad_h(w_v, b_v)
    w_qkv = jnp.concatenate([wq_p, wk_p, wv_p], axis=1).astype(qkv_dtype)
    b_qkv = jnp.concatenate([bq_p, bk_p, bv_p]).reshape(1, 3 * Hp)
    b_qkv = b_qkv.astype(jnp.float32)

    # Column tile of the fused weight (multiple of 128 dividing Hp, <= 512).
    if Hp <= 512:
        TN = Hp
    else:
        TN = 128
        for cand in (512, 384, 256):
            if Hp % cand == 0:
                TN = cand
                break
    n_col = (3 * Hp) // TN

    # --- Kernel 1: fused QKV projection -> one (B, S_pad, 3*Hp) buffer ------
    vmem1 = (2 * TQ * D_in * qkv_bytes          # x tile (double-buffered)
             + 2 * D_in * TN * qkv_bytes        # weight column tile
             + 2 * TN * 4                       # bias tile
             + 2 * TQ * TN * qkv_bytes)         # output tile
    qkv = pl.pallas_call(
        _qkv_proj_kernel,
        out_shape=jax.ShapeDtypeStruct((B, S_pad, 3 * Hp), qkv_dtype),
        grid_spec=pltpu.PrefetchScalarGridSpec(
            num_scalar_prefetch=0,
            grid=(B, n_q, n_col),
            in_specs=[
                pl.BlockSpec((1, TQ, D_in), lambda b, s, n: (b, s, 0)),   # x
                pl.BlockSpec((D_in, TN), lambda b, s, n: (0, n)),         # fused W
                pl.BlockSpec((1, TN), lambda b, s, n: (0, n)),            # fused b
            ],
            out_specs=pl.BlockSpec((1, TQ, TN), lambda b, s, n: (b, s, n)),
        ),
        compiler_params=pltpu.CompilerParams(
            dimension_semantics=("parallel", "parallel", "parallel"),
            vmem_limit_bytes=_vmem_limit(vmem1)),
    )(x, w_qkv, b_qkv)

    # --- Kernel 2: flash attention over the fused QKV buffer ----------------
    # Q/K/V are column-block views (block indices 0/1/2 along the last dim) of
    # the same (B, S_pad, 3*Hp) array.
    vmem2 = (2 * TQ * Hp * qkv_bytes            # Q tile
             + 2 * 2 * TK * Hp * qkv_bytes      # K, V tiles
             + 2 * TQ * Hp * out_bytes          # output tile
             + TQ * Hp * 4 + 2 * TQ * 4)        # acc + m/l scratch
    out_pad = pl.pallas_call(
        functools.partial(_flash_attn_kernel, seq_len=S, seq_pad=S_pad,
                          block_k=TK, approx_recip=approx_recip),
        out_shape=jax.ShapeDtypeStruct((B, S_pad, Hp), out_dtype),
        grid_spec=pltpu.PrefetchScalarGridSpec(
            num_scalar_prefetch=0,
            grid=(B, n_q, n_k),
            in_specs=[
                pl.BlockSpec((1, TQ, Hp), lambda b, qi, ki: (b, qi, 0)),  # Q
                pl.BlockSpec((1, TK, Hp), lambda b, qi, ki: (b, ki, 1)),  # K
                pl.BlockSpec((1, TK, Hp), lambda b, qi, ki: (b, ki, 2)),  # V
            ],
            out_specs=pl.BlockSpec((1, TQ, Hp), lambda b, qi, ki: (b, qi, 0)),
            scratch_shapes=[
                pltpu.VMEM((TQ, 1), jnp.float32),    # running max m
                pltpu.VMEM((TQ, 1), jnp.float32),    # running denom l
                pltpu.VMEM((TQ, Hp), jnp.float32),   # output accumulator
            ],
        ),
        compiler_params=pltpu.CompilerParams(
            dimension_semantics=("parallel", "parallel", "arbitrary"),
            vmem_limit_bytes=_vmem_limit(vmem2)),
    )(qkv, qkv, qkv)

    # Strip sequence / hidden padding (wrapper-side, plain JAX).
    return out_pad[:, :S, :H]


# ----------------------------------------------------------------------------
# Reference + demo
# ----------------------------------------------------------------------------
def _init_linear(key, in_dim, out_dim):
    # Deterministic init matching nn.Linear's uniform(-1/sqrt(in), 1/sqrt(in)).
    kw, kb = jax.random.split(key)
    bound = 1.0 / math.sqrt(in_dim)
    w = jax.random.uniform(kw, (in_dim, out_dim), jnp.float32, -bound, bound)
    b = jax.random.uniform(kb, (out_dim,), jnp.float32, -bound, bound)
    return w, b


def _reference(x, w_q, b_q, w_k, b_k, w_v, b_v):
    q = x @ w_q + b_q
    k = x @ w_k + b_k
    v = x @ w_v + b_v
    scores = jnp.einsum("bqd,bkd->bqk", q, k) / math.sqrt(k.shape[-1])
    weights = jax.nn.softmax(scores, axis=-1)
    return jnp.einsum("bqk,bkd->bqd", weights, v)


if __name__ == "__main__":
    B, S, D_in, H = 2, 8, 32, 32

    key = jax.random.PRNGKey(0)
    kx, kq, kk, kv = jax.random.split(key, 4)

    x = jax.random.normal(kx, (B, S, D_in), jnp.float32)
    w_q, b_q = _init_linear(kq, D_in, H)
    w_k, b_k = _init_linear(kk, D_in, H)
    w_v, b_v = _init_linear(kv, D_in, H)

    ref = _reference(x, w_q, b_q, w_k, b_k, w_v, b_v)

    # Default path: bf16 MXU operands, f32 accumulation (loose tolerance).
    out_bf16 = standard_attention(x, w_q, b_q, w_k, b_k, w_v, b_v)
    out_bf16 = jax.block_until_ready(out_bf16)
    assert out_bf16.shape == (B, S, H)
    err_bf16 = float(jnp.max(jnp.abs(out_bf16 - ref)))
    assert jnp.allclose(out_bf16, ref, atol=3e-2, rtol=3e-2), err_bf16

    # Full-precision path: f32 operands, exact reciprocal (tight tolerance).
    out_f32 = standard_attention(x, w_q, b_q, w_k, b_k, w_v, b_v,
                                 qkv_dtype=jnp.float32)
    out_f32 = jax.block_until_ready(out_f32)
    err_f32 = float(jnp.max(jnp.abs(out_f32 - ref)))
    assert jnp.allclose(out_f32, ref, atol=1e-4, rtol=1e-4), err_f32

    print("KERNEL_OK")
</pallas_src>

<mosaic_0001>
module attributes {stable_mosaic.version = 11 : i64} {
  func.func @_qkv_proj_kernel(%arg0: i32, %arg1: i32, %arg2: i32, %arg3: memref<1x16x32xbf16, #tpu.memory_space<vmem>>, %arg4: memref<32x128xbf16, #tpu.memory_space<vmem>>, %arg5: memref<1x128xf32, #tpu.memory_space<vmem>>, %arg6: memref<1x16x128xbf16, #tpu.memory_space<vmem>>) attributes {dimension_semantics = [#tpu.dimension_semantics<parallel>, #tpu.dimension_semantics<parallel>, #tpu.dimension_semantics<parallel>], iteration_bounds = array<i64: 2, 1, 3>, scalar_prefetch = 0 : i64, scratch_operands = 0 : i64, tpu.core_type = #tpu.core_type<tc>, window_params = [{transform_indices = @transform_0, window_bounds = array<i64: 1, 16, 32>}, {transform_indices = @transform_1, window_bounds = array<i64: 32, 128>}, {transform_indices = @transform_2, window_bounds = array<i64: 1, 128>}, {transform_indices = @transform_3, window_bounds = array<i64: 1, 16, 128>}]} {
    %c0 = arith.constant 0 : index
    %c0_0 = arith.constant 0 : index
    %c0_1 = arith.constant 0 : index
    %0 = vector.load %arg3[%c0, %c0_0, %c0_1] : memref<1x16x32xbf16, #tpu.memory_space<vmem>>, vector<1x16x32xbf16>
    %1 = vector.shape_cast %0 : vector<1x16x32xbf16> to vector<16x32xbf16>
    %c0_2 = arith.constant 0 : index
    %c0_3 = arith.constant 0 : index
    %2 = vector.load %arg4[%c0_2, %c0_3] : memref<32x128xbf16, #tpu.memory_space<vmem>>, vector<32x128xbf16>
    %cst = arith.constant dense<0.000000e+00> : vector<16x128xf32>
    %3 = tpu.matmul %1, %2, %cst {dimension_numbers = #tpu.dot_dimension_numbers<[1], [0], [0], [1], [0, 0, 1, 1], [], []>} : vector<16x32xbf16>, vector<32x128xbf16>, vector<16x128xf32> -> vector<16x128xf32>
    %c0_4 = arith.constant 0 : index
    %c0_5 = arith.constant 0 : index
    %4 = vector.load %arg5[%c0_4, %c0_5] : memref<1x128xf32, #tpu.memory_space<vmem>>, vector<1x128xf32>
    %5 = vector.broadcast %4 : vector<1x128xf32> to vector<16x128xf32>
    %6 = arith.addf %3, %5 : vector<16x128xf32>
    %7 = arith.truncf %6 : vector<16x128xf32> to vector<16x128xbf16>
    %c0_6 = arith.constant 0 : index
    %c0_7 = arith.constant 0 : index
    %c0_8 = arith.constant 0 : index
    %8 = vector.load %arg6[%c0_6, %c0_7, %c0_8] : memref<1x16x128xbf16, #tpu.memory_space<vmem>>, vector<1x16x128xbf16>
    %9 = vector.shape_cast %8 : vector<1x16x128xbf16> to vector<16x128xbf16>
    %10 = vector.shape_cast %7 : vector<16x128xbf16> to vector<1x16x128xbf16>
    tpu.vector_store %arg6[%c0_6, %c0_7, %c0_8], %10 {strides = array<i32>} : memref<1x16x128xbf16, #tpu.memory_space<vmem>>, vector<1x16x128xbf16>,
    return
  }
  func.func @transform_0(%arg0: i32, %arg1: i32, %arg2: i32) -> (i32, i32, i32) {
    %c0_i32 = arith.constant 0 : i32
    %c0_i32_0 = arith.constant 0 : i32
    return %arg0, %arg1, %c0_i32 : i32, i32, i32
  }
  func.func @transform_1(%arg0: i32, %arg1: i32, %arg2: i32) -> (i32, i32) {
    %c0_i32 = arith.constant 0 : i32
    %c0_i32_0 = arith.constant 0 : i32
    return %c0_i32, %arg2 : i32, i32
  }
  func.func @transform_2(%arg0: i32, %arg1: i32, %arg2: i32) -> (i32, i32) {
    %c0_i32 = arith.constant 0 : i32
    %c0_i32_0 = arith.constant 0 : i32
    return %c0_i32, %arg2 : i32, i32
  }
  func.func @transform_3(%arg0: i32, %arg1: i32, %arg2: i32) -> (i32, i32, i32) {
    %c0_i32 = arith.constant 0 : i32
    return %arg0, %arg1, %arg2 : i32, i32, i32
  }
}

</mosaic_0001>

<bundles_post_ra>
// kernel: tpu_custom_call.1
= control target key start
LH: loop header
LB: loop body
LE: loop exit
PB: predicated region body
PF: predicated region fallthrough
CT: control target
= control target key end

     0   :  { %s1217_s0 = inlined_call_operand.hbm [shape: bf16[2,16,32], index: 0, kind: input, shape index: {}]   ;;  %s1218_s1 = inlined_call_operand.hbm [shape: bf16[32,384], index: 1, kind: input, shape index: {}]   ;;  %s1219_s2 = inlined_call_operand.vmem [shape: f32[1,384], index: 2, kind: input, shape index: {}]   ;;  %s1220_s3 = inlined_call_operand.hbm [shape: bf16[2,16,384], index: 3, kind: output, shape index: {}]  }
   0x1   :  { %1230 = sst [smem:[#allocation17_spill]] %s1217_s0 }
   0x2   :  { %1231 = sst [smem:[#allocation18_spill]] %s1219_s2 }
   0x3   :  { %1232 = sst [smem:[#allocation19_spill]] %s1220_s3 }
   0x4   :  { %8 = vsyncpa [#allocation3], 0 }
   0x5   :  { %10 = vsyncpa [#allocation3 + $0x1], 0 }
   0x6   :  { %11 = vsyncpa [#allocation6], 0 }
   0x7   :  { %13 = vsyncpa [#allocation6 + $0x1], 0 }
   0x8   :  { %14 = vsyncpa [#allocation4], 0 }
   0x9   :  { %16 = vsyncpa [#allocation4 + $0x1], 0  ;;  %s924_s12 = smov 0   ;;  %s926_s13 = smov 0  }
   0xa   :  { %s928_s14 = smov 0   ;;  %s930_s15 = smov 0  }
   0xb   :  { %s932_s16 = smov 0   ;;  %s934_s17 = smov 0  }
   0xc   :  { %s936_s18 = smov 0   ;;  %s938_s19 = smov 0  }
   0xd   :  { %s940_s20 = smov 0   ;;  %s942_s21 = smov 0  }
   0xe   :  { %s944_s22 = smov 0   ;;  %s946_s23 = smov 0  }
   0xf   :  { %s948_s24 = smov 0   ;;  %s950_s25 = smov 0  }
  0x10 LB: > { %1233 = sst [smem:[#allocation11_spill]] %s879_s22  ;;  %s501_s26 = sadd.s32 4294967295, %s891_s25   ;;  %s891_s25 = sphi %s950_s25, %s22_s25   ;;  %s887_s24 = sphi %s948_s24, %s1265_s24   ;;  %s883_s23 = sphi %s946_s23, %s1278_s23   ;;  %s879_s22 = sphi %s944_s22, %s1277_s22   ;;  %s875_s21 = sphi %s942_s21, %s1276_s21   ;;  %s871_s20 = sphi %s940_s20, %s1275_s20   ;;  %s867_s19 = sphi %s938_s19, %s1274_s19   ;;  %s863_s18 = sphi %s936_s18, %s1273_s18   ;;  %s859_s17 = sphi %s934_s17, %s1272_s17   ;;  %s855_s16 = sphi %s932_s16, %s1271_s16   ;;  %s851_s15 = sphi %s930_s15, %s1270_s15   ;;  %s847_s14 = sphi %s928_s14, %s1269_s14   ;;  %s843_s13 = sphi %s926_s13, %s1268_s13   ;;  %s839_s12 = sphi %s924_s12, %s1267_s12  }
  0x11   : > { %1234 = sst [smem:[#allocation12_spill]] %s887_s24  ;;  %p57_p0 = scmp.ne.s32.totalorder %s871_s20, %s867_s19 }
  0x12   : > { %p58_p1 = scmp.eq.s32.totalorder %s891_s25, 0  ;;  %p63_p2 = scmp.ne.s32.totalorder %s867_s19, %s863_s18 }
  0x13   : > { %p999_p3 = scmp.eq.s32.totalorder %s501_s26, 0  ;;  %p1003_p4 = scmp.eq.s32.totalorder %s501_s26, 5 }
  0x14   : > { %p59_p5 = por %p58_p1, %p57_p0  ;;  %p562_p7 = scmp.lt.s32.totalorder %s891_s25, 6 }
  0x15   : > { %p1011_p6 = por %p999_p3, %p63_p2  ;;  %s169_s5 = sand.u32 1, %s871_s20  }
  0x16   : > { %s525_s6 = sshll.u32 %s887_s24, 7  ;;  %s505_s7 = sshll.u32 %s169_s5, 3 }
  0x17   : > { %s1238_s0 = sld [smem:[#allocation17_spill]]  ;;  %s173_s11 = scalar_lea.vmem [#allocation2], %s505_s7 }
  0x18   : > { %s182_s18 = sshll.u32 %s173_s11, 4  ;;  %p1023_p8 = pnand %p562_p7, %p59_p5  ;;  %s183_s18 = int_to_ptr.vmem [resolvable:$true] %s182_s18 }
  0x19   : > { %s170_s28 = scalar_lea.sflag [#allocation3], %s169_s5  ;;  %s700_s27 = scalar_lea.vmem %s183_s18, 128 }
  0x1a   : > { %p689_p9 = pneg %p1023_p8  ;;  %p701_p10 = scmp.ne.s32.totalorder %s183_s18, %s700_s27 }
  0x1b   : > { %s893_s3 = smov [#allocation2]  }
  0x1c   : > { %p703_p11 = pnand %p701_p10, %p689_p9  ;;  %s705_s2 = sshll.u32 %s893_s3, 4  ;;  %s706_s2 = int_to_ptr.vmem [resolvable:$false] %s705_s2 }
  0x1d   : > { %s181_s10 = scalar_lea.hbm %s1238_s0, %s525_s6  ;;  %s707_s6 = scalar_lea.vmem %s706_s2, 256 }
  0x1e   : > { %p704_p12 = pneg %p703_p11  ;;  %p708_p13 = scmp.lt.s32.totalorder %s183_s18, %s706_s2 }
  0x1f   : > { %p709_p0 = scmp.lt.s32.totalorder %s707_s6, %s700_s27 }
  0x21   : > { %p710_p2 = por %p709_p0, %p708_p13 }
  0x23   : > { %p711_p5 = pnand %p710_p2, %p704_p12 }
  0x25   : > { %714 = shalt.err (!%p711_p5)
}
  0x26   : > { %s1222_s7 = smov 64   ;;  %s1223_s2 = smov 4  }
  0x27   : > { %554 = dma.hbm_to_vmem [thread:$0]  (!%p1023_p8), %s181_s10, 128, %s183_s18, %s170_s28, %s1222_s7, %s1222_s7, %s1223_s2  }
  0x28   : > { %p510_p9 = scmp.ge.s32.totalorder %s891_s25, 1  ;;  %p216_p10 = scmp.lt.s32.totalorder %s891_s25, 7 }
  0x29   : > { %s502_s27 = sadd.s32 4294967294, %s891_s25   ;;  %s34_s5 = sadd.s32 1, %s883_s23 }
  0x2a   : > { %p1036_p11 = pnand %p510_p9, %p216_p10  ;;  %s76_s8 = sadd.s32 1, %s859_s17 }
  0x2b   : > { %p35_p12 = scmp.ge.s32.totalorder %s34_s5, 3  ;;  %p83_p13 = scmp.ne.s32.totalorder %s859_s17, %s855_s16 }
  0x2c   : > { %p89_p0 = scmp.ne.s32.totalorder %s855_s16, %s851_s15  ;;  %s132_s9 = sadd.s32 1, %s847_s14 }
  0x2d   : > { %s1280_s5 = smov (%p35_p12, %s34_s5), 0  ;;  %s1242_s28 = sadd.s32 1, %s887_s24 }
  0x2e   : > { %1241 = sst [smem:[#allocation13_spill]] %s1280_s5  ;;  %s1282_s28 = smov (!%p35_p12, %s1242_s28), %s887_s24 }
  0x2f   : > { %s73_s10 = ssub.s32 %s883_s23, %s1280_s5  ;;  %p1057_p8 = por %p83_p13, %p58_p1 }
  0x30   : > { %p43_p2 = scmp.ge.s32.totalorder %s1282_s28, 2  ;;  %p74_p5 = scmp.eq.s32.totalorder %s73_s10, 0 }
  0x31   : > { %p1063_p9 = por %p89_p0, %p999_p3  ;;  %p142_p10 = scmp.ne.s32.totalorder %s847_s14, %s843_s13 }
  0x32   : > { %s1284_s28 = smov (%p43_p2, %s1282_s28), 0  ;;  %p148_p13 = scmp.ne.s32.totalorder %s843_s13, %s839_s12 }
  0x33   : > { %1245 = sst [smem:[#allocation14_spill]] %s1284_s28  ;;  %s45_s26 = ssub.s32 %s887_s24, %s1284_s28 }
  0x34   : > { %s1072_s18 = scalar_select %p74_p5, %s859_s17, %s76_s8  }
  0x35   : > { %p1078_p1 = por %p1003_p4, %p142_p10  ;;  %p48_p12 = scmp.eq.s32.totalorder %s45_s26, 0 }
  0x36   : > { %1246 = sst [smem:[#allocation15_spill]] %s1072_s18  ;;  %s129_s29 = sor.u32 %s73_s10, %s45_s26 }
  0x37   : > { %s1247_s6 = scalar_select %p1078_p1, 1, 0 }
  0x38   : > { %p130_p3 = scmp.eq.s32.totalorder %s129_s29, 0  ;;  %s1249_s7 = sadd.s32 1, %s871_s20 }
  0x39   : > { %1248 = sst [smem:[#allocation16_spill]] %s1247_s6  ;;  %p149_p0 = scmp.eq.s32.totalorder %s502_s27, 5 }
  0x3a   : > { %s1087_s2 = scalar_select %p48_p12, %s871_s20, %s1249_s7  }
  0x3b   : > { %s1090_s0 = scalar_select %p130_p3, %s847_s14, %s132_s9  }
  0x3c   : > { %s192_s8 = sand.u32 1, %s859_s17   ;;  %p1093_p2 = por %p149_p0, %p148_p13 }
  0x3d   : > { %s508_s5 = sshll.u32 %s192_s8, 4  ;;  %s509_s28 = sshll.u32 %s883_s23, 6 }
  0x3e   : > { %s1250_s30 = scalar_select %p1093_p2, 1, 0 }
  0x3f   : > { %s196_s24 = scalar_lea.vmem [#allocation5], %s508_s5  ;;  %s201_s10 = scalar_lea.hbm %s1218_s1, %s509_s28 }
  0x40   : > { %s202_s18 = sshll.u32 %s196_s24, 4  ;;  %p1105_p4 = pnand %p562_p7, %p1057_p8  ;;  %s203_s18 = int_to_ptr.vmem [resolvable:$true] %s202_s18 }
  0x41   : > { %s193_s27 = scalar_lea.sflag [#allocation6], %s192_s8  ;;  %s728_s9 = scalar_lea.vmem %s203_s18, 256 }
  0x42   : > { %p717_p5 = pneg %p1105_p4  ;;  %p729_p10 = scmp.ne.s32.totalorder %s203_s18, %s728_s9 }
  0x43   : > { %s896_s24 = smov [#allocation5]  }
  0x44   : > { %p731_p12 = pnand %p729_p10, %p717_p5  ;;  %s733_s5 = sshll.u32 %s896_s24, 4  ;;  %s734_s5 = int_to_ptr.vmem [resolvable:$false] %s733_s5 }
  0x45   : > { %s735_s22 = scalar_lea.vmem %s734_s5, 512  ;;  %p736_p13 = scmp.lt.s32.totalorder %s203_s18, %s734_s5 }
  0x46   : > { %p732_p3 = pneg %p731_p12  ;;  %p737_p0 = scmp.lt.s32.totalorder %s735_s22, %s728_s9 }
  0x48   : > { %p738_p2 = por %p737_p0, %p736_p13 }
  0x4a   : > { %p739_p1 = pnand %p738_p2, %p732_p3 }
  0x4c   : > { %742 = shalt.err (!%p739_p1)
}
  0x4d   : > { %s897_s28 = smov 192   ;;  %s1252_s11 = smov 4  }
  0x4e   : > { %s1253_s26 = smov 64   ;;  %220 = sbr.rel (%p1036_p11) target bundleno = 313 (0x139), region = 32 }
  0x4f   : > { %557 = dma.hbm_to_vmem [thread:$0]  (!%p1105_p4), %s201_s10, 256, %s203_s18, %s193_s27, %s897_s28, %s1253_s26, %s1252_s11  }
  0x50   : > { %s222_s6 = sand.u32 (!%p1036_p11), 1, %s867_s19  }
  0x51   : > { %s511_s29 = sshll.u32 (!%p1036_p11), %s222_s6, 3  ;;  %s223_s8 = scalar_lea.sflag (!%p1036_p11), [#allocation3], %s222_s6 }
  0x52   : > { %s226_s24 = scalar_lea.vmem (!%p1036_p11), [#allocation2], %s511_s29 }
  0x53   : > { %826 = dma.done.wait (%p1011_p6), %s223_s8, 128  }
  0x54   : > { %828 = vsyncadd (%p1011_p6), %s223_s8, 4294967168  ;;  %s231_s7 = sand.u32 1, %s855_s16  }
  0x55   : > { %s512_s9 = sshll.u32 %s231_s7, 4  ;;  %s232_s5 = scalar_lea.sflag [#allocation6], %s231_s7 }
  0x56   : > { %s235_s18 = scalar_lea.vmem [#allocation5], %s512_s9 }
  0x57   : > { %830 = dma.done.wait (%p1063_p9), %s232_s5, 256  }
  0x58   : > { %832 = vsyncadd (%p1063_p9), %s232_s5, 4294967040  ;;  %v898_v0 = vmov 0.0   ;;  %s1254_s3 = sld [smem:[#allocation11_spill]]  ;;  %vm899_vm0 = vmmov 0   ;;  %v684_v1 = vld [vmem:[%s235_s18 + $0x8] sm:$0xff]   ;;  %v685_v2 = vld [vmem:[%s235_s18] sm:$0xff]  }
  0x59   : > { %536 = vmatprep.subr.bf16.mxu0 %v898_v0  ;;  %540 = vmatprep.mubr.msk.bf16.mxu0 %vm899_vm0, %v898_v0  ;;  %v686_v3 = vld [vmem:[%s226_s24] sm:$0xff]   ;;  %vm302_vm1 = vcmask 261120   ;;  %p267_p6 = scmp.lt.s32.totalorder %s875_s21, 2  ;;  %s263_s4 = sand.u32 1, %s843_s13  }
  0x5a   : > { %537 = vmatpush3.bf16.msra.mxu0 %v684_v1  ;;  %s513_s10 = sshll.u32 %s263_s4, 3  ;;  %s1255_s11 = sld [smem:[#allocation18_spill]] }
  0x5b   : > { %538 = vmatprep.subr.bf16.mxu0 %v898_v0  ;;  %s268_s15 = scalar_select %p267_p6, %s875_s21, 2 }
  0x5c   : > { %s1256_s29 = sld [smem:[#allocation16_spill]]  ;;  %s265_s8 = scalar_lea.vmem [#allocation7], %s513_s10 }
  0x5d   : > { %s375_s7 = sshll.u32 %s265_s8, 4  ;;  %s1257_s18 = sld [smem:[#allocation19_spill]]  ;;  %s1135_s7 = int_to_ptr.vmem [resolvable:$true] %s375_s7 }
  0x5e   : > { %539 = vmatpush3.bf16.msra.mxu0 %v685_v2  ;;  %s544_s27 = smul.u32 6, %s1254_s3  ;;  %s743_s10 = scalar_lea.vmem %s1135_s7, 128 }
  0x5f   : > { %p744_p7 = scmp.ne.s32.totalorder %s1135_s7, %s743_s10 }
  0x60   : > { %s269_s26 = scalar_lea.vmem %s1255_s11, %s268_s15  ;;  %s372_s6 = sadd.s32 %s875_s21, %s544_s27 }
  0x61   : > { %541 = vmatmul.mubr.msk.bf16.vlgmr.msra.gmra.mxu0 %vm302_vm1, %v686_v3  ;;  %v514_v5 = vld [vmem:[%s269_s26] ss:$0 sm:$0xff]  ;;  %s522_s24 = sshll.u32 %s372_s6, 6  ;;  %s1142_s21 = scalar_lea.sflag [#allocation4], %s263_s4 }
  0x62   : > { %p1259_p11 = scmp.ne.s32.totalorder %s1256_s29, 0  ;;  %s900_s27 = smov [#allocation7]  }
  0x63   : > { %s1258_s3 = smov %s1257_s18  ;;  %s1140_s15 = scalar_lea.hbm %s1257_s18, %s522_s24 }
  0x64   : > { %p745_p8 = pnand %p744_p7, %p1259_p11  ;;  %s747_s22 = sshll.u32 %s900_s27, 4  ;;  %s748_s22 = int_to_ptr.vmem [resolvable:$false] %s747_s22 }
  0x65   : > { %s749_s28 = scalar_lea.vmem %s748_s22, 256  ;;  %p750_p1 = scmp.lt.s32.totalorder %s1135_s7, %s748_s22 }
  0x66   : > { %p746_p9 = pneg %p745_p8  ;;  %p751_p2 = scmp.lt.s32.totalorder %s749_s28, %s743_s10 }
  0x68   : > { %p752_p4 = por %p751_p2, %p750_p1 }
  0x6a   : > { %p753_p5 = pnand %p752_p4, %p746_p9 }
 0x121   : > { %v340_v4 = vpop.f32.mrf.mxu0 }
 0x122   : > { %v341_v8 = vadd.f32 %v514_v5, %v340_v4 }
 0x123   : > { %v542_v6 = vpop.f32.mrf.mxu0 }
 0x125   : > { %v343_v7 = vpop.f32.mrf.mxu0 }
 0x126   : > { %v344_v9 = vadd.f32 %v514_v5, %v343_v7 }
 0x127   : > { %v543_v10 = vpop.f32.mrf.mxu0 }
 0x128   : > { %v531_v11 = vpack.c.bf16 %v344_v9, %v341_v8 }
 0x12a   : > { %532 = vst [vmem:[%s265_s8] sm:$0xff] %v531_v11  }
 0x12b   : > { %756 = shalt.err (!%p753_p5)
}
 0x12c   : > { %s757_s4 = scalar_lea.hbm %s1140_s15, 128  ;;  %s761_s6 = scalar_lea.hbm %s1258_s3, 768 }
 0x12d   : > { %p758_p10 = scmp.ne.s32.totalorder %s1140_s15, %s757_s4  ;;  %p762_p13 = scmp.lt.s32.totalorder %s1140_s15, %s1258_s3 }
 0x12e   : > { %p763_p0 = scmp.lt.s32.totalorder %s761_s6, %s757_s4 }
 0x12f   : > { %p759_p12 = pnand %p758_p10, %p1259_p11 }
 0x130   : > { %p764_p6 = por %p763_p0, %p762_p13 }
 0x131   : > { %p760_p3 = pneg %p759_p12 }
 0x133   : > { %p765_p7 = pnand %p764_p6, %p760_p3 }
 0x135   : > { %768 = shalt.err (!%p765_p7)
}
 0x136   : > { %s901_s9 = smov 64   ;;  %s902_s5 = smov 192  }
 0x137   : > { %s903_s18 = smov 4  }
 0x138   : > { %549 = dma.vmem_to_hbm [thread:$0]  (%p1259_p11), %s1135_s7, 128, %s1140_s15, %s1142_s21, %s901_s9, %s902_s5, %s903_s18  }
 0x139 PF: > { %p563_p8 = scmp.ge.s32.totalorder %s891_s25, 2  ;;  %s390_s10 = sand.u32 1, %s839_s12  }
 0x13a   : > { %p1260_p9 = scmp.ne.s32.totalorder %s1250_s30, 0  ;;  %s391_s27 = scalar_lea.sflag [#allocation4], %s390_s10 }
 0x13c   : > { %p559_p1 = pnand %p563_p8, %p1260_p9 }
 0x13e   : > { %p560_p2 = pneg %p559_p1 }
 0x140   : > { %834 = dma.done.wait (%p560_p2), %s391_s27, 128  }
 0x141   : > { %836 = vsyncadd (%p560_p2), %s391_s27, 4294967168  ;;  %s22_s25 = sadd.s32 1, %s891_s25   ;;  %s1262_s29 = sld [smem:[#allocation15_spill]] }
 0x142   : > { %p1170_p4 = scmp.ge.s32.totalorder %s22_s25, 8   ;;  %s1263_s30 = sld [smem:[#allocation12_spill]] }
 0x143   : > { %s1264_s7 = sld [smem:[#allocation13_spill]]  ;;  %s1267_s12 = smov %s843_s13 }
 0x144   : > { %s1265_s24 = sld [smem:[#allocation14_spill]]  ;;  %s1268_s13 = smov %s847_s14 }
 0x145   : > { %s1269_s14 = smov %s1090_s0  ;;  %s1270_s15 = smov %s855_s16 }
 0x146   : > { %s1271_s16 = smov %s859_s17  ;;  %s1273_s18 = smov %s867_s19 }
 0x147   : > { %s1272_s17 = smov %s1262_s29  ;;  %s1274_s19 = smov %s871_s20 }
 0x148   : > { %s1275_s20 = smov %s1087_s2  ;;  %s1276_s21 = smov %s883_s23 }
 0x149   : > { %s1277_s22 = smov %s1263_s30  ;;  %s1278_s23 = smov %s1264_s7 }
 0x14a   :  { %21 = sbr.rel (!%p1170_p4) target bundleno = 16 (0x10), region = 93 }
 0x14f   :  { %396 = vsyncpa [#allocation3], 1 }
 0x150   :  { %398 = vsyncpa [#allocation3 + $0x1], 1 }
 0x151   :  { %399 = vsyncpa [#allocation6], 1 }
 0x152   :  { %401 = vsyncpa [#allocation6 + $0x1], 1 }
 0x153   :  { %402 = vsyncpa [#allocation4], 1 }
 0x154   :  { %404 = vsyncpa [#allocation4 + $0x1], 1 }

</bundles_post_ra>
